<compile_context>
chip_gen: v6e
topology: v6e:2x2x1
jax: 0.10.0
libtpu: 0.0.40
codegen_flags: <defaults>
</compile_context>

<pallas_src>
import functools

import jax
import jax.numpy as jnp
from jax.experimental import pallas as pl
from jax.experimental.pallas import tpu as pltpu

D_MODEL = 32          # d_model; must be divisible by 8 (GroupNorm groups)
GROUPS = 8
EPS = 1e-5
_INV_SQRT2 = 0.7071067811865476
_LANE = 128


def _erf(x):
    """Abramowitz & Stegun 7.1.26 polynomial erf, |error| < 1.5e-7."""
    a1, a2, a3, a4, a5 = (0.254829592, -0.284496736, 1.421413741,
                          -1.453152027, 1.061405429)
    p = 0.3275911
    ax = jnp.abs(x)
    t = 1.0 / (1.0 + p * ax)
    poly = ((((a5 * t + a4) * t + a3) * t + a2) * t + a1) * t
    y = 1.0 - poly * jnp.exp(-ax * ax)
    return jnp.where(x < 0.0, -y, y)


def _gelu_exact(x):
    return 0.5 * x * (1.0 + _erf(x * _INV_SQRT2))


def ffn_kernel(x_ref, kprev_ref, knext_ref, seg_ref, segt_ref,
               w1_ref, w2_ref, p_ref, gamma_ref, beta_ref, o_ref,
               *, inv_denom, eps):
    x = x_ref[...]                       # (n, cp) f32; n = bt*L rows, cp = pack*C lanes
    n, cp = x.shape
    kprev = kprev_ref[...]               # (n, 1) 0/1: zero where row is first of its sequence
    knext = knext_ref[...]               # (n, 1) 0/1: zero where row is last of its sequence

    def conv3(z, w_ref):
        # Taps see x[l-1] / x[l] / x[l+1]; rolled rows that cross a sequence
        # boundary are zeroed (== Conv1d zero padding).  All 3 taps run as a
        # single (n, 3*cp) @ (3*cp, cp) MXU matmul.
        z_prev = jnp.roll(z, 1, axis=0) * kprev
        z_next = jnp.roll(z, -1, axis=0) * knext
        z3 = jnp.concatenate([z_prev, z, z_next], axis=1)
        return jnp.dot(z3, w_ref[...], preferred_element_type=jnp.float32)

    # ---- Conv1d #1 (bias=False) ----
    h = conv3(x, w1_ref)

    # ---- GroupNorm(8): stats per (batch element, group) ----
    # One matmul against the segment matrix gives both moments per original
    # batch element; the block-diagonal P matrix spreads group sums back to
    # every channel of the group; one more small matmul broadcasts the
    # per-segment affine (a, b) to every row.
    hh = jnp.concatenate([h, h * h], axis=1)                             # (n, 2cp)
    s = jnp.dot(seg_ref[...], hh, preferred_element_type=jnp.float32)    # (btp, 2cp)
    gsum = jnp.dot(s[:, :cp], p_ref[...], preferred_element_type=jnp.float32)
    gsumsq = jnp.dot(s[:, cp:], p_ref[...], preferred_element_type=jnp.float32)
    mean = gsum * inv_denom
    var = jnp.maximum(gsumsq * inv_denom - mean * mean, 0.0)   # clamp one-pass var
    inv_std = jax.lax.rsqrt(var + eps)
    a = inv_std * gamma_ref[...]                                # (btp, cp)
    b = beta_ref[...] - mean * a                                # (btp, cp)
    ab = jnp.dot(segt_ref[...], jnp.concatenate([a, b], axis=1),
                 preferred_element_type=jnp.float32)            # (n, 2cp)
    hn = h * ab[:, :cp] + ab[:, cp:]

    # ---- exact (erf) GELU ----
    g = _gelu_exact(hn)

    # ---- Conv1d #2 (bias=False) ----
    o_ref[...] = conv3(g, w2_ref)


def _choose_block_batches(num_seq_blocks, seq_len, target_rows=1024):
    """How many packed sequences per grid step.

    Must divide the number of packed sequences; resulting row count must be a
    multiple of 8 (sublane tiling) unless it covers the whole array; prefer
    >=2 grid steps so both v7x TensorCores get work; aim for ~target_rows rows
    per step to amortize per-step pipeline overhead.
    """
    bp = num_seq_blocks
    legal = [bt for bt in range(1, bp + 1)
             if bp % bt == 0 and ((bt * seq_len) % 8 == 0 or bt == bp)]
    pref = [bt for bt in legal if bt <= max(1, bp // 2)] or legal
    fit = [bt for bt in pref if bt * seq_len <= target_rows]
    return max(fit) if fit else min(pref)


def vanilla_ffn_pallas(src, w1, w2, gamma, beta, *, block_rows_target=1024):
    """src: (B, L, C).  w1/w2: PyTorch Conv1d weights (C_out, C_in, 3)."""
    B, L, C = src.shape
    assert C % GROUPS == 0, "GroupNorm(8) requires d_model % 8 == 0"

    # Pack `pack` batch elements along the 128-wide lane axis (lane-dense
    # compute and stores).  Weights / P / gamma / beta become block-diagonal.
    pack = _LANE // C if (C < _LANE and _LANE % C == 0) else 1
    b_pad = ((B + pack - 1) // pack) * pack
    if b_pad != B:
        src = jnp.concatenate(
            [src, jnp.zeros((b_pad - B, L, C), src.dtype)], axis=0)
    bp = b_pad // pack
    cp = pack * C

    # (bp, pack, L, C) -> (bp, L, pack, C) -> (bp*L, pack*C)
    xp = (src.reshape(bp, pack, L, C)
             .transpose(0, 2, 1, 3)
             .reshape(bp * L, cp)
             .astype(jnp.float32))
    # TODO(synk): bf16 activations/weights (f32 accumulation) would halve HBM
    # traffic; kept f32 here for exact parity with the f32 PyTorch module.

    bt = _choose_block_batches(bp, L, block_rows_target)
    n_blk = bt * L                      # rows per grid step
    grid = bp // bt
    bt_pad = ((bt + 7) // 8) * 8        # pad segment axis to >=8 sublanes

    eye_p = jnp.eye(pack, dtype=jnp.float32)

    def prep_conv_weight(w):
        # (C_out, C_in, 3) -> per-tap (C_in, C_out) -> block-diag (cp, cp)
        # -> stacked (3*cp, cp) so the 3 taps are one fused matmul.
        taps = [jnp.kron(eye_p, w[:, :, k].T.astype(jnp.float32))
                for k in range(3)]
        return jnp.concatenate(taps, axis=0)

    w1f = prep_conv_weight(w1)
    w2f = prep_conv_weight(w2)

    gsize = C // GROUPS
    gid = jnp.arange(C) // gsize
    p32 = (gid[:, None] == gid[None, :]).astype(jnp.float32)    # (C, C)
    p_mat = jnp.kron(eye_p, p32)                                # (cp, cp)
    gamma_p = jnp.tile(gamma.astype(jnp.float32), pack).reshape(1, cp)
    beta_p = jnp.tile(beta.astype(jnp.float32), pack).reshape(1, cp)

    # Per-block constants (identical for every grid step).
    r = jnp.arange(n_blk)
    keep_prev = (r % L != 0).astype(jnp.float32).reshape(n_blk, 1)
    keep_next = (r % L != L - 1).astype(jnp.float32).reshape(n_blk, 1)
    seg_mat = (jnp.arange(bt_pad)[:, None] == (r // L)[None, :]
               ).astype(jnp.float32)                            # (bt_pad, n_blk)
    segt_mat = seg_mat.T                                        # (n_blk, bt_pad)

    kernel = functools.partial(
        ffn_kernel, inv_denom=1.0 / float(L * gsize), eps=EPS)

    const = lambda i: (0, 0)
    out_p = pl.pallas_call(
        kernel,
        out_shape=jax.ShapeDtypeStruct((bp * L, cp), jnp.float32),
        grid_spec=pltpu.PrefetchScalarGridSpec(
            num_scalar_prefetch=0,
            grid=(grid,),
            in_specs=[
                pl.BlockSpec((n_blk, cp), lambda i: (i, 0)),     # x block
                pl.BlockSpec((n_blk, 1), const),                 # keep_prev mask
                pl.BlockSpec((n_blk, 1), const),                 # keep_next mask
                pl.BlockSpec((bt_pad, n_blk), const),            # segment matrix
                pl.BlockSpec((n_blk, bt_pad), const),            # its transpose
                pl.BlockSpec((3 * cp, cp), const),               # fused conv1 weight
                pl.BlockSpec((3 * cp, cp), const),               # fused conv2 weight
                pl.BlockSpec((cp, cp), const),                   # group-spread P
                pl.BlockSpec((1, cp), const),                    # gamma
                pl.BlockSpec((1, cp), const),                    # beta
            ],
            out_specs=pl.BlockSpec((n_blk, cp), lambda i: (i, 0)),
        ),
        compiler_params=pltpu.CompilerParams(
            dimension_semantics=("parallel",),     # megacore-shard batch blocks
            vmem_limit_bytes=32 * 1024 * 1024,     # sized for v7x's smaller VMEM
        ),
    )(xp, keep_prev, keep_next, seg_mat, segt_mat,
      w1f, w2f, p_mat, gamma_p, beta_p)

    out = (out_p.reshape(bp, L, pack, C)
                .transpose(0, 2, 1, 3)
                .reshape(b_pad, L, C))
    return out[:B]


def ref_forward(src, w1, w2, gamma, beta):
    """Pure-JAX reference matching the PyTorch module."""
    x = jnp.transpose(src, (0, 2, 1))                  # (B, C, L)

    def conv(z, w):
        return jax.lax.conv_general_dilated(
            z, w, window_strides=(1,), padding=[(1, 1)],
            dimension_numbers=("NCH", "OIH", "NCH"),
            precision=jax.lax.Precision.HIGHEST)

    h = conv(x, w1)
    B, C, L = h.shape
    hg = h.reshape(B, GROUPS, C // GROUPS, L)
    mean = hg.mean(axis=(2, 3), keepdims=True)
    var = hg.var(axis=(2, 3), keepdims=True)
    hn = ((hg - mean) / jnp.sqrt(var + EPS)).reshape(B, C, L)
    hn = hn * gamma[None, :, None] + beta[None, :, None]
    g = jax.nn.gelu(hn, approximate=False)
    y = conv(g, w2)
    return jnp.transpose(y, (0, 2, 1))


if __name__ == "__main__":
    B, L, C = 14, 16, D_MODEL           # B not a multiple of 4: exercises padding
    key = jax.random.PRNGKey(0)
    k_src, k_w1, k_w2, k_g, k_b = jax.random.split(key, 5)

    src = jax.random.normal(k_src, (B, L, C), dtype=jnp.float32)
    # PyTorch Conv1d weight layout: (C_out, C_in, K)
    w1 = jax.random.normal(k_w1, (C, C, 3), dtype=jnp.float32) * 0.1
    w2 = jax.random.normal(k_w2, (C, C, 3), dtype=jnp.float32) * 0.1
    gamma = 1.0 + 0.1 * jax.random.normal(k_g, (C,), dtype=jnp.float32)
    beta = 0.1 * jax.random.normal(k_b, (C,), dtype=jnp.float32)

    out = jax.jit(vanilla_ffn_pallas)(src, w1, w2, gamma, beta)
    out = jax.block_until_ready(out)

    ref = ref_forward(src, w1, w2, gamma, beta)
    assert out.shape == (B, L, C), out.shape
    err = float(jnp.max(jnp.abs(out - ref)))
    # Fully-f32 paths agree to ~1e-5; the looser bound only absorbs backends
    # that execute f32 matmuls as reduced-precision MXU passes.  Genuine
    # layout/algorithm bugs would show up as O(1) errors.
    assert err < 2e-2, f"max abs err {err}"
    print("KERNEL_OK")
</pallas_src>

<mosaic_0001>
module attributes {stable_mosaic.version = 11 : i64} {
  func.func @ffn_kernel(%arg0: i32, %arg1: memref<32x128xf32, #tpu.memory_space<vmem>>, %arg2: memref<32x1xf32, #tpu.memory_space<vmem>>, %arg3: memref<32x1xf32, #tpu.memory_space<vmem>>, %arg4: memref<8x32xf32, #tpu.memory_space<vmem>>, %arg5: memref<32x8xf32, #tpu.memory_space<vmem>>, %arg6: memref<384x128xf32, #tpu.memory_space<vmem>>, %arg7: memref<384x128xf32, #tpu.memory_space<vmem>>, %arg8: memref<128x128xf32, #tpu.memory_space<vmem>>, %arg9: memref<1x128xf32, #tpu.memory_space<vmem>>, %arg10: memref<1x128xf32, #tpu.memory_space<vmem>>, %arg11: memref<32x128xf32, #tpu.memory_space<vmem>>) attributes {dimension_semantics = [#tpu.dimension_semantics<parallel>], iteration_bounds = array<i64: 2>, scalar_prefetch = 0 : i64, scratch_operands = 0 : i64, tpu.core_type = #tpu.core_type<tc>, window_params = [{transform_indices = @transform_0, window_bounds = array<i64: 32, 128>}, {pipeline_mode = #tpu.pipeline_mode<synchronous>, transform_indices = @transform_1, window_bounds = array<i64: 32, 1>}, {pipeline_mode = #tpu.pipeline_mode<synchronous>, transform_indices = @transform_2, window_bounds = array<i64: 32, 1>}, {pipeline_mode = #tpu.pipeline_mode<synchronous>, transform_indices = @transform_3, window_bounds = array<i64: 8, 32>}, {pipeline_mode = #tpu.pipeline_mode<synchronous>, transform_indices = @transform_4, window_bounds = array<i64: 32, 8>}, {pipeline_mode = #tpu.pipeline_mode<synchronous>, transform_indices = @transform_5, window_bounds = array<i64: 384, 128>}, {pipeline_mode = #tpu.pipeline_mode<synchronous>, transform_indices = @transform_6, window_bounds = array<i64: 384, 128>}, {pipeline_mode = #tpu.pipeline_mode<synchronous>, transform_indices = @transform_7, window_bounds = array<i64: 128, 128>}, {pipeline_mode = #tpu.pipeline_mode<synchronous>, transform_indices = @transform_8, window_bounds = array<i64: 1, 128>}, {pipeline_mode = #tpu.pipeline_mode<synchronous>, transform_indices = @transform_9, window_bounds = array<i64: 1, 128>}, {transform_indices = @transform_10, window_bounds = array<i64: 32, 128>}]} {
    %c0 = arith.constant 0 : index
    %c0_0 = arith.constant 0 : index
    %0 = vector.load %arg1[%c0, %c0_0] : memref<32x128xf32, #tpu.memory_space<vmem>>, vector<32x128xf32>
    %c0_1 = arith.constant 0 : index
    %c0_2 = arith.constant 0 : index
    %1 = vector.load %arg2[%c0_1, %c0_2] : memref<32x1xf32, #tpu.memory_space<vmem>>, vector<32x1xf32>
    %c0_3 = arith.constant 0 : index
    %c0_4 = arith.constant 0 : index
    %2 = vector.load %arg3[%c0_3, %c0_4] : memref<32x1xf32, #tpu.memory_space<vmem>>, vector<32x1xf32>
    %3 = vector.extract_strided_slice %0 {offsets = [31, 0], sizes = [1, 128], strides = [1, 1]} : vector<32x128xf32> to vector<1x128xf32>
    %4 = vector.extract_strided_slice %0 {offsets = [0, 0], sizes = [31, 128], strides = [1, 1]} : vector<32x128xf32> to vector<31x128xf32>
    %5 = tpu.concatenate %3, %4 in 0 : vector<1x128xf32>, vector<31x128xf32> -> vector<32x128xf32>
    %6 = vector.broadcast %1 : vector<32x1xf32> to vector<32x128xf32>
    %7 = arith.mulf %5, %6 : vector<32x128xf32>
    %8 = vector.extract_strided_slice %0 {offsets = [1, 0], sizes = [31, 128], strides = [1, 1]} : vector<32x128xf32> to vector<31x128xf32>
    %9 = vector.extract_strided_slice %0 {offsets = [0, 0], sizes = [1, 128], strides = [1, 1]} : vector<32x128xf32> to vector<1x128xf32>
    %10 = tpu.concatenate %8, %9 in 0 : vector<31x128xf32>, vector<1x128xf32> -> vector<32x128xf32>
    %11 = vector.broadcast %2 : vector<32x1xf32> to vector<32x128xf32>
    %12 = arith.mulf %10, %11 : vector<32x128xf32>
    %13 = tpu.concatenate %7, %0, %12 in 1 : vector<32x128xf32>, vector<32x128xf32>, vector<32x128xf32> -> vector<32x384xf32>
    %c0_5 = arith.constant 0 : index
    %c0_6 = arith.constant 0 : index
    %14 = vector.load %arg6[%c0_5, %c0_6] : memref<384x128xf32, #tpu.memory_space<vmem>>, vector<384x128xf32>
    %cst = arith.constant dense<0.000000e+00> : vector<32x128xf32>
    %15 = tpu.matmul %13, %14, %cst {dimension_numbers = #tpu.dot_dimension_numbers<[1], [0], [0], [1], [0, 0, 1, 1], [], []>} : vector<32x384xf32>, vector<384x128xf32>, vector<32x128xf32> -> vector<32x128xf32>
    %16 = arith.mulf %15, %15 : vector<32x128xf32>
    %17 = tpu.concatenate %15, %16 in 1 : vector<32x128xf32>, vector<32x128xf32> -> vector<32x256xf32>
    %c0_7 = arith.constant 0 : index
    %c0_8 = arith.constant 0 : index
    %18 = vector.load %arg4[%c0_7, %c0_8] : memref<8x32xf32, #tpu.memory_space<vmem>>, vector<8x32xf32>
    %cst_9 = arith.constant dense<0.000000e+00> : vector<8x256xf32>
    %19 = tpu.matmul %18, %17, %cst_9 {dimension_numbers = #tpu.dot_dimension_numbers<[1], [0], [0], [1], [0, 0, 1, 1], [], []>} : vector<8x32xf32>, vector<32x256xf32>, vector<8x256xf32> -> vector<8x256xf32>
    %20 = vector.extract_strided_slice %19 {offsets = [0, 0], sizes = [8, 128], strides = [1, 1]} : vector<8x256xf32> to vector<8x128xf32>
    %c0_10 = arith.constant 0 : index
    %c0_11 = arith.constant 0 : index
    %21 = vector.load %arg8[%c0_10, %c0_11] : memref<128x128xf32, #tpu.memory_space<vmem>>, vector<128x128xf32>
    %cst_12 = arith.constant dense<0.000000e+00> : vector<8x128xf32>
    %22 = tpu.matmul %20, %21, %cst_12 {dimension_numbers = #tpu.dot_dimension_numbers<[1], [0], [0], [1], [0, 0, 1, 1], [], []>} : vector<8x128xf32>, vector<128x128xf32>, vector<8x128xf32> -> vector<8x128xf32>
    %23 = vector.extract_strided_slice %19 {offsets = [0, 128], sizes = [8, 128], strides = [1, 1]} : vector<8x256xf32> to vector<8x128xf32>
    %c0_13 = arith.constant 0 : index
    %c0_14 = arith.constant 0 : index
    %24 = vector.load %arg8[%c0_13, %c0_14] : memref<128x128xf32, #tpu.memory_space<vmem>>, vector<128x128xf32>
    %cst_15 = arith.constant dense<0.000000e+00> : vector<8x128xf32>
    %25 = tpu.matmul %23, %24, %cst_15 {dimension_numbers = #tpu.dot_dimension_numbers<[1], [0], [0], [1], [0, 0, 1, 1], [], []>} : vector<8x128xf32>, vector<128x128xf32>, vector<8x128xf32> -> vector<8x128xf32>
    %cst_16 = arith.constant 1.562500e-02 : f32
    %26 = vector.broadcast %cst_16 : f32 to vector<8x128xf32>
    %27 = arith.mulf %22, %26 : vector<8x128xf32>
    %cst_17 = arith.constant 1.562500e-02 : f32
    %28 = vector.broadcast %cst_17 : f32 to vector<8x128xf32>
    %29 = arith.mulf %25, %28 : vector<8x128xf32>
    %30 = arith.mulf %27, %27 : vector<8x128xf32>
    %31 = arith.subf %29, %30 : vector<8x128xf32>
    %cst_18 = arith.constant 0.000000e+00 : f32
    %32 = vector.broadcast %cst_18 : f32 to vector<8x128xf32>
    %33 = arith.maximumf %31, %32 : vector<8x128xf32>
    %cst_19 = arith.constant 9.99999974E-6 : f32
    %34 = vector.broadcast %cst_19 : f32 to vector<8x128xf32>
    %35 = arith.addf %33, %34 : vector<8x128xf32>
    %36 = math.rsqrt %35 : vector<8x128xf32>
    %c0_20 = arith.constant 0 : index
    %c0_21 = arith.constant 0 : index
    %37 = vector.load %arg9[%c0_20, %c0_21] : memref<1x128xf32, #tpu.memory_space<vmem>>, vector<1x128xf32>
    %38 = vector.broadcast %37 : vector<1x128xf32> to vector<8x128xf32>
    %39 = arith.mulf %36, %38 : vector<8x128xf32>
    %c0_22 = arith.constant 0 : index
    %c0_23 = arith.constant 0 : index
    %40 = vector.load %arg10[%c0_22, %c0_23] : memref<1x128xf32, #tpu.memory_space<vmem>>, vector<1x128xf32>
    %41 = arith.mulf %27, %39 : vector<8x128xf32>
    %42 = vector.broadcast %40 : vector<1x128xf32> to vector<8x128xf32>
    %43 = arith.subf %42, %41 : vector<8x128xf32>
    %c0_24 = arith.constant 0 : index
    %c0_25 = arith.constant 0 : index
    %44 = vector.load %arg5[%c0_24, %c0_25] : memref<32x8xf32, #tpu.memory_space<vmem>>, vector<32x8xf32>
    %45 = tpu.concatenate %39, %43 in 1 : vector<8x128xf32>, vector<8x128xf32> -> vector<8x256xf32>
    %cst_26 = arith.constant dense<0.000000e+00> : vector<32x256xf32>
    %46 = tpu.matmul %44, %45, %cst_26 {dimension_numbers = #tpu.dot_dimension_numbers<[1], [0], [0], [1], [0, 0, 1, 1], [], []>} : vector<32x8xf32>, vector<8x256xf32>, vector<32x256xf32> -> vector<32x256xf32>
    %47 = vector.extract_strided_slice %46 {offsets = [0, 0], sizes = [32, 128], strides = [1, 1]} : vector<32x256xf32> to vector<32x128xf32>
    %48 = arith.mulf %15, %47 : vector<32x128xf32>
    %49 = vector.extract_strided_slice %46 {offsets = [0, 128], sizes = [32, 128], strides = [1, 1]} : vector<32x256xf32> to vector<32x128xf32>
    %50 = arith.addf %48, %49 : vector<32x128xf32>
    %cst_27 = arith.constant 5.000000e-01 : f32
    %51 = vector.broadcast %cst_27 : f32 to vector<32x128xf32>
    %52 = arith.mulf %51, %50 : vector<32x128xf32>
    %cst_28 = arith.constant 0.707106769 : f32
    %53 = vector.broadcast %cst_28 : f32 to vector<32x128xf32>
    %54 = arith.mulf %50, %53 : vector<32x128xf32>
    %55 = math.absf %54 : vector<32x128xf32>
    %cst_29 = arith.constant 0.327591091 : f32
    %56 = vector.broadcast %cst_29 : f32 to vector<32x128xf32>
    %57 = arith.mulf %56, %55 : vector<32x128xf32>
    %cst_30 = arith.constant 1.000000e+00 : f32
    %58 = vector.broadcast %cst_30 : f32 to vector<32x128xf32>
    %59 = arith.addf %58, %57 : vector<32x128xf32>
    %cst_31 = arith.constant 1.000000e+00 : f32
    %60 = vector.broadcast %cst_31 : f32 to vector<32x128xf32>
    %61 = arith.divf %60, %59 : vector<32x128xf32>
    %cst_32 = arith.constant 1.06140542 : f32
    %62 = vector.broadcast %cst_32 : f32 to vector<32x128xf32>
    %63 = arith.mulf %62, %61 : vector<32x128xf32>
    %cst_33 = arith.constant -1.45315206 : f32
    %64 = vector.broadcast %cst_33 : f32 to vector<32x128xf32>
    %65 = arith.addf %63, %64 : vector<32x128xf32>
    %66 = arith.mulf %65, %61 : vector<32x128xf32>
    %cst_34 = arith.constant 1.42141378 : f32
    %67 = vector.broadcast %cst_34 : f32 to vector<32x128xf32>
    %68 = arith.addf %66, %67 : vector<32x128xf32>
    %69 = arith.mulf %68, %61 : vector<32x128xf32>
    %cst_35 = arith.constant -0.284496725 : f32
    %70 = vector.broadcast %cst_35 : f32 to vector<32x128xf32>
    %71 = arith.addf %69, %70 : vector<32x128xf32>
    %72 = arith.mulf %71, %61 : vector<32x128xf32>
    %cst_36 = arith.constant 0.254829586 : f32
    %73 = vector.broadcast %cst_36 : f32 to vector<32x128xf32>
    %74 = arith.addf %72, %73 : vector<32x128xf32>
    %75 = arith.mulf %74, %61 : vector<32x128xf32>
    %cst_37 = arith.constant 0.000000e+00 : f32
    %76 = vector.broadcast %cst_37 : f32 to vector<32x128xf32>
    %77 = arith.subf %76, %55 : vector<32x128xf32>
    %78 = arith.mulf %77, %55 : vector<32x128xf32>
    %79 = math.exp %78 : vector<32x128xf32>
    %80 = arith.mulf %75, %79 : vector<32x128xf32>
    %cst_38 = arith.constant 1.000000e+00 : f32
    %81 = vector.broadcast %cst_38 : f32 to vector<32x128xf32>
    %82 = arith.subf %81, %80 : vector<32x128xf32>
    %cst_39 = arith.constant 0.000000e+00 : f32
    %83 = vector.broadcast %cst_39 : f32 to vector<32x128xf32>
    %84 = arith.cmpf olt, %54, %83 : vector<32x128xf32>
    %cst_40 = arith.constant 0.000000e+00 : f32
    %85 = vector.broadcast %cst_40 : f32 to vector<32x128xf32>
    %86 = arith.subf %85, %82 : vector<32x128xf32>
    %87 = arith.select %84, %86, %82 : vector<32x128xi1>, vector<32x128xf32>
    %cst_41 = arith.constant 1.000000e+00 : f32
    %88 = vector.broadcast %cst_41 : f32 to vector<32x128xf32>
    %89 = arith.addf %88, %87 : vector<32x128xf32>
    %90 = arith.mulf %52, %89 : vector<32x128xf32>
    %91 = vector.extract_strided_slice %90 {offsets = [31, 0], sizes = [1, 128], strides = [1, 1]} : vector<32x128xf32> to vector<1x128xf32>
    %92 = vector.extract_strided_slice %90 {offsets = [0, 0], sizes = [31, 128], strides = [1, 1]} : vector<32x128xf32> to vector<31x128xf32>
    %93 = tpu.concatenate %91, %92 in 0 : vector<1x128xf32>, vector<31x128xf32> -> vector<32x128xf32>
    %94 = vector.broadcast %1 : vector<32x1xf32> to vector<32x128xf32>
    %95 = arith.mulf %93, %94 : vector<32x128xf32>
    %96 = vector.extract_strided_slice %90 {offsets = [1, 0], sizes = [31, 128], strides = [1, 1]} : vector<32x128xf32> to vector<31x128xf32>
    %97 = vector.extract_strided_slice %90 {offsets = [0, 0], sizes = [1, 128], strides = [1, 1]} : vector<32x128xf32> to vector<1x128xf32>
    %98 = tpu.concatenate %96, %97 in 0 : vector<31x128xf32>, vector<1x128xf32> -> vector<32x128xf32>
    %99 = vector.broadcast %2 : vector<32x1xf32> to vector<32x128xf32>
    %100 = arith.mulf %98, %99 : vector<32x128xf32>
    %101 = tpu.concatenate %95, %90, %100 in 1 : vector<32x128xf32>, vector<32x128xf32>, vector<32x128xf32> -> vector<32x384xf32>
    %c0_42 = arith.constant 0 : index
    %c0_43 = arith.constant 0 : index
    %102 = vector.load %arg7[%c0_42, %c0_43] : memref<384x128xf32, #tpu.memory_space<vmem>>, vector<384x128xf32>
    %cst_44 = arith.constant dense<0.000000e+00> : vector<32x128xf32>
    %103 = tpu.matmul %101, %102, %cst_44 {dimension_numbers = #tpu.dot_dimension_numbers<[1], [0], [0], [1], [0, 0, 1, 1], [], []>} : vector<32x384xf32>, vector<384x128xf32>, vector<32x128xf32> -> vector<32x128xf32>
    %c0_45 = arith.constant 0 : index
    %c0_46 = arith.constant 0 : index
    %104 = vector.load %arg11[%c0_45, %c0_46] : memref<32x128xf32, #tpu.memory_space<vmem>>, vector<32x128xf32>
    tpu.vector_store %arg11[%c0_45, %c0_46], %103 {strides = array<i32>} : memref<32x128xf32, #tpu.memory_space<vmem>>, vector<32x128xf32>,
    return
  }
  func.func @transform_0(%arg0: i32) -> (i32, i32) {
    %c0_i32 = arith.constant 0 : i32
    %c0_i32_0 = arith.constant 0 : i32
    return %arg0, %c0_i32 : i32, i32
  }
  func.func @transform_1(%arg0: i32) -> (i32, i32) {
    %c0_i32 = arith.constant 0 : i32
    %c0_i32_0 = arith.constant 0 : i32
    %c0_i32_1 = arith.constant 0 : i32
    return %c0_i32, %c0_i32_0 : i32, i32
  }
  func.func @transform_2(%arg0: i32) -> (i32, i32) {
    %c0_i32 = arith.constant 0 : i32
    %c0_i32_0 = arith.constant 0 : i32
    %c0_i32_1 = arith.constant 0 : i32
    return %c0_i32, %c0_i32_0 : i32, i32
  }
  func.func @transform_3(%arg0: i32) -> (i32, i32) {
    %c0_i32 = arith.constant 0 : i32
    %c0_i32_0 = arith.constant 0 : i32
    %c0_i32_1 = arith.constant 0 : i32
    return %c0_i32, %c0_i32_0 : i32, i32
  }
  func.func @transform_4(%arg0: i32) -> (i32, i32) {
    %c0_i32 = arith.constant 0 : i32
    %c0_i32_0 = arith.constant 0 : i32
    %c0_i32_1 = arith.constant 0 : i32
    return %c0_i32, %c0_i32_0 : i32, i32
  }
  func.func @transform_5(%arg0: i32) -> (i32, i32) {
    %c0_i32 = arith.constant 0 : i32
    %c0_i32_0 = arith.constant 0 : i32
    %c0_i32_1 = arith.constant 0 : i32
    return %c0_i32, %c0_i32_0 : i32, i32
  }
  func.func @transform_6(%arg0: i32) -> (i32, i32) {
    %c0_i32 = arith.constant 0 : i32
    %c0_i32_0 = arith.constant 0 : i32
    %c0_i32_1 = arith.constant 0 : i32
    return %c0_i32, %c0_i32_0 : i32, i32
  }
  func.func @transform_7(%arg0: i32) -> (i32, i32) {
    %c0_i32 = arith.constant 0 : i32
    %c0_i32_0 = arith.constant 0 : i32
    %c0_i32_1 = arith.constant 0 : i32
    return %c0_i32, %c0_i32_0 : i32, i32
  }
  func.func @transform_8(%arg0: i32) -> (i32, i32) {
    %c0_i32 = arith.constant 0 : i32
    %c0_i32_0 = arith.constant 0 : i32
    %c0_i32_1 = arith.constant 0 : i32
    return %c0_i32, %c0_i32_0 : i32, i32
  }
  func.func @transform_9(%arg0: i32) -> (i32, i32) {
    %c0_i32 = arith.constant 0 : i32
    %c0_i32_0 = arith.constant 0 : i32
    %c0_i32_1 = arith.constant 0 : i32
    return %c0_i32, %c0_i32_0 : i32, i32
  }
  func.func @transform_10(%arg0: i32) -> (i32, i32) {
    %c0_i32 = arith.constant 0 : i32
    %c0_i32_0 = arith.constant 0 : i32
    return %arg0, %c0_i32 : i32, i32
  }
}

</mosaic_0001>

<bundles_post_ra>
// kernel: tile.13
= control target key start
LH: loop header
LB: loop body
LE: loop exit
PB: predicated region body
PF: predicated region fallthrough
CT: control target
= control target key end

     0   :  { %s22_s0 = inlined_call_operand.vmem [shape: f32[32], index: 0, kind: input, shape index: {}]   ;;  %s23_s1 = inlined_call_operand.vmem [shape: f32[4,32], index: 1, kind: output, shape index: {}]  }
   0x1   :  { %v4_v0 = vld [vmem:[%s22_s0] ss:$0 sm:$0xff] }
   0x2   :  { %5 = vst [vmem:[%s23_s1] sm:$0xf] %v4_v0 }

// kernel: tile.14
= control target key start
LH: loop header
LB: loop body
LE: loop exit
PB: predicated region body
PF: predicated region fallthrough
CT: control target
= control target key end

     0   :  { %vm8_vm0 = vcmask 261120   ;;  %s40_s8 = smov 32   ;;  %s41_s9 = smov 64   ;;  %vm14_vm1 = vcmask 1048320   ;;  %vm20_vm2 = vcmask 785920   ;;  %vm26_vm3 = vcmask 523520   ;;  %s58_s0 = inlined_call_operand.vmem [shape: f32[4,32], index: 0, kind: input, shape index: {}]   ;;  %s59_s1 = inlined_call_operand.vmem [shape: f32[1,128], index: 1, kind: output, shape index: {}]  }
   0x1   :  { %v5_v0 = vld [vmem:[%s58_s0] sm:$0xf]  ;;  %s39_s0 = smov 96  }
   0x2   :  { %6 = vst [vmem:[#allocation1] sm:$0xf] %v5_v0 }
   0x9   :  { %v11_v1 = vld [vmem:[#allocation1 + $0x3] sm:$0x1]   ;;  %v23_v2 = vld [vmem:[#allocation1 + $0x1] sm:$0x1]   ;;  %v7_v3 = vld [vmem:[#allocation1] sm:$0x1]  }
   0xa   :  { %12 = vrot.lane.b32.xlu0 %v11_v1, %s39_s0  ;;  %24 = vrot.lane.b32.xlu1 %v23_v2, %s40_s8  ;;  %v17_v4 = vld [vmem:[#allocation1 + $0x2] sm:$0x1]   ;;  %9 = vst.msk [vmem:[#allocation0] sm:$0x1] %vm8_vm0, %v7_v3  }
   0xe   :  { %18 = vrot.lane.b32.xlu0 %v17_v4, %s41_s9 }
  0x7c   :  { %v13_v5 = vpop.permute.xlu0 %12   ;;  %v25_v6 = vpop.permute.xlu1 %24  }
  0x7d   :  { %15 = vst.msk [vmem:[#allocation0] sm:$0x1] %vm14_vm1, %v13_v5  }
  0x80   :  { %v19_v7 = vpop.permute.xlu0 %18  }
  0x81   :  { %21 = vst.msk [vmem:[#allocation0] sm:$0x1] %vm20_vm2, %v19_v7  }
  0x82   :  { %27 = vst.msk [vmem:[#allocation0] sm:$0x1] %vm26_vm3, %v25_v6  }
  0x89   :  { %v32_v8 = vld [vmem:[#allocation0] sm:$0x1] }
  0x8a   :  { %35 = vst [vmem:[%s59_s1] sm:$0x1] %v32_v8 }

// kernel: vanilla_ffn_pallas.1
= control target key start
LH: loop header
LB: loop body
LE: loop exit
PB: predicated region body
PF: predicated region fallthrough
CT: control target
= control target key end

     0   :  { %s1894_s13 = smov 0   ;;  %s2547_s0 = inlined_call_operand.vmem [shape: f32[64,128], index: 0, kind: input, shape index: {}]   ;;  %s2548_s1 = inlined_call_operand.vmem [shape: f32[32,1], index: 1, kind: input, shape index: {}]   ;;  %s2549_s2 = inlined_call_operand.vmem [shape: f32[32,1], index: 2, kind: input, shape index: {}]   ;;  %s2550_s3 = inlined_call_operand.vmem [shape: f32[8,32], index: 3, kind: input, shape index: {}]   ;;  %s2551_s4 = inlined_call_operand.vmem [shape: f32[32,8], index: 4, kind: input, shape index: {}]   ;;  %s2552_s5 = inlined_call_operand.vmem [shape: f32[384,128], index: 5, kind: input, shape index: {}]   ;;  %s2553_s6 = inlined_call_operand.vmem [shape: f32[384,128], index: 6, kind: input, shape index: {}]   ;;  %s2554_s7 = inlined_call_operand.vmem [shape: f32[128,128], index: 7, kind: input, shape index: {}]   ;;  %s2555_s8 = inlined_call_operand.vmem [shape: f32[1,128], index: 8, kind: input, shape index: {}]   ;;  %s2556_s9 = inlined_call_operand.vmem [shape: f32[1,128], index: 9, kind: input, shape index: {}]   ;;  %s2557_s10 = inlined_call_operand.vmem [shape: f32[64,128], index: 10, kind: output, shape index: {}]  }
   0x1 LB: > { %s1471_s14 = sadd.s32 4294967295, %s1834_s13   ;;  %p1475_p0 = scmp.ge.s32.totalorder %s1834_s13, 1  ;;  %s1834_s13 = sphi %s1894_s13, %s20_s13  }
   0x2   : > { %p313_p1 = scmp.lt.s32.totalorder %s1834_s13, 3 }
   0x4   : > { %p314_p2 = pnand %p1475_p0, %p313_p1 }
   0x5   : > { %s1476_s19 = sshll.u32 (!%p314_p2), %s1471_s14, 2 }
   0x6   : > { %317 = sbr.rel (%p314_p2) target bundleno = 1256 (0x4e8), region = 60  ;;  %p352_p3 = scmp.lt.s32.totalorder (!%p314_p2), %s1476_s19, 7 }
   0xb   : > { %v369_v0 = vld [vmem:[%s2548_s1 + $0x10] sm:$0xff]  ;;  %v367_v1 = vld [vmem:[%s2548_s1] sm:$0xff]  ;;  %v1836_v2 = vmov 0   ;;  %v486_v4 = vld [vmem:[%s2552_s5 + $0xf8] sm:$0xff]  ;;  %s2559_s19 = smov (!%p352_p3, %s1476_s19), 7  ;;  %vm381_vm0 = vcmask 1040384  }
   0xc   : > { %1809 = vset.pattern.permute.xlu1 %v1836_v2  ;;  %1808 = vset.pattern.permute.xlu0 %v1836_v2  ;;  %v371_v3 = vld [vmem:[%s2549_s2] sm:$0xff]  ;;  %v368_v5 = vld [vmem:[%s2548_s1 + $0x8] sm:$0xff]  ;;  %v470_v6 = vld [vmem:[%s2552_s5 + $0x78] sm:$0xff]  ;;  %s1477_s20 = sshll.u32 %s2559_s19, 3  ;;  %vm417_vm1 = vcmask 1046528   ;;  %vm678_vm2 = vcmask 261120  }
   0xd   : > { %405 = vperm.xlu1 %1809, %v369_v0   ;;  %395 = vperm.xlu0 %1808, %v367_v1   ;;  %v485_v7 = vld [vmem:[%s2552_s5 + $0xf0] sm:$0xff]  ;;  %v484_v9 = vld [vmem:[%s2552_s5 + $0xe8] sm:$0xff]  ;;  %v502_v10 = vld [vmem:[%s2552_s5 + $0x178] sm:$0xff]  ;;  %s1986_s14 = scalar_lea.vmem %s2547_s0, %s1477_s20  ;;  %vm1838_vm3 = vmmov 0   ;;  %vm937_vm4 = vcmask 64512   ;;  %s361_s22 = scalar_lea.vmem %s2557_s10, %s1477_s20 }
   0xe   : > { %1489 = vmatprep.subr.mxu0 %v486_v4  ;;  %v469_v8 = vld [vmem:[%s2552_s5 + $0x70] sm:$0xff]  ;;  %v468_v11 = vld [vmem:[%s2552_s5 + $0x68] sm:$0xff]  ;;  %v370_v14 = vld [vmem:[%s2548_s1 + $0x18] sm:$0xff]  ;;  %1651 = vmatprep.subr.mxu1 %v502_v10 }
   0xf   : > { %1490 = vmatpush3.msra.mxu0 %v470_v6  ;;  %v501_v12 = vld [vmem:[%s2552_s5 + $0x170] sm:$0xff]  ;;  %v372_v13 = vld [vmem:[%s2549_s2 + $0x8] sm:$0xff]  ;;  %v483_v15 = vld [vmem:[%s2552_s5 + $0xe0] sm:$0xff]  ;;  %1652 = vmatpush3.msra.mxu1 %v502_v10 }
  0x10   : > { %1491 = vmatprep.subr.mxu0 %v485_v7  ;;  %v467_v16 = vld [vmem:[%s2552_s5 + $0x60] sm:$0xff]  ;;  %1653 = vmatprep.subr.mxu1 %v501_v12  ;;  %v500_v17 = vld [vmem:[%s2552_s5 + $0x168] sm:$0xff]  ;;  %v482_v18 = vld [vmem:[%s2552_s5 + $0xd8] sm:$0xff] }
  0x11   : > { %433 = vperm.xlu1 %1809, %v371_v3   ;;  %400 = vperm.xlu0 %1808, %v368_v5   ;;  %v374_v19 = vld [vmem:[%s2549_s2 + $0x18] sm:$0xff]  ;;  %v373_v20 = vld [vmem:[%s2549_s2 + $0x10] sm:$0xff]  ;;  %v499_v22 = vld [vmem:[%s2552_s5 + $0x160] sm:$0xff] }
  0x12   : > { %1492 = vmatpush3.msra.mxu0 %v469_v8  ;;  %1654 = vmatpush3.msra.mxu1 %v501_v12  ;;  %v466_v21 = vld [vmem:[%s2552_s5 + $0x58] sm:$0xff]  ;;  %v481_v23 = vld [vmem:[%s2552_s5 + $0xd0] sm:$0xff]  ;;  %v480_v26 = vld [vmem:[%s2552_s5 + $0xc8] sm:$0xff] }
  0x13   : > { %1493 = vmatprep.subr.mxu0 %v484_v9  ;;  %1655 = vmatprep.subr.mxu1 %v500_v17  ;;  %v465_v24 = vld [vmem:[%s2552_s5 + $0x50] sm:$0xff]  ;;  %v498_v25 = vld [vmem:[%s2552_s5 + $0x158] sm:$0xff]  ;;  %v464_v27 = vld [vmem:[%s2552_s5 + $0x48] sm:$0xff] }
  0x14   : > { %1494 = vmatpush3.msra.mxu0 %v468_v11  ;;  %1656 = vmatpush3.msra.mxu1 %v500_v17  ;;  %v497_v28 = vld [vmem:[%s2552_s5 + $0x150] sm:$0xff]  ;;  %v1998_v29 = vld [vmem:[%s1986_s14 + $0x8] sm:$0xff]  ;;  %v479_v30 = vld [vmem:[%s2552_s5 + $0xc0] sm:$0xff] }
  0x15   : > { %438 = vperm.xlu1 %1809, %v372_v13   ;;  %410 = vperm.xlu0 %1808, %v370_v14   ;;  %v383_v31 = vrot.slane %v1998_v29, 7  ;;  %v363_v32 = vld [vmem:[%s1986_s14] sm:$0xff]  ;;  %v2006_v33 = vld [vmem:[%s1986_s14 + $0x18] sm:$0xff]  ;;  %v419_v34 = vrot.slane %v1998_v29, 1  ;;  %v496_v36 = vld [vmem:[%s2552_s5 + $0x148] sm:$0xff] }
  0x16   : > { %1495 = vmatprep.subr.mxu0 %v483_v15  ;;  %1657 = vmatprep.subr.mxu1 %v499_v22  ;;  %v463_v35 = vld [vmem:[%s2552_s5 + $0x40] sm:$0xff]  ;;  %v376_v37 = vrot.slane %v2006_v33, 7  ;;  %v382_v38 = vrot.slane %v363_v32, 7  ;;  %v418_v39 = vrot.slane %v363_v32, 1  ;;  %v478_v40 = vld [vmem:[%s2552_s5 + $0xb8] sm:$0xff]  ;;  %v423_v41 = vrot.slane %v2006_v33, 1 }
  0x17   : > { %1496 = vmatpush3.msra.mxu0 %v467_v16  ;;  %1658 = vmatpush3.msra.mxu1 %v499_v22  ;;  %v462_v42 = vld [vmem:[%s2552_s5 + $0x38] sm:$0xff]  ;;  %v495_v43 = vld [vmem:[%s2552_s5 + $0x140] sm:$0xff]  ;;  %v477_v47 = vld [vmem:[%s2552_s5 + $0xb0] sm:$0xff] }
  0x18   : > { %1497 = vmatprep.subr.mxu0 %v482_v18  ;;  %1659 = vmatprep.subr.mxu1 %v498_v25  ;;  %v2029_v44 = vsel %vm381_vm0, %v376_v37, %v382_v38  ;;  %v2034_v45 = vsel %vm381_vm0, %v382_v38, %v383_v31  ;;  %v2039_v46 = vsel %vm417_vm1, %v418_v39, %v419_v34  ;;  %v461_v49 = vld [vmem:[%s2552_s5 + $0x30] sm:$0xff]  ;;  %v494_v50 = vld [vmem:[%s2552_s5 + $0x138] sm:$0xff]  ;;  %v476_v51 = vld [vmem:[%s2552_s5 + $0xa8] sm:$0xff] }
  0x19   : > { %448 = vperm.xlu1 %1809, %v374_v19   ;;  %443 = vperm.xlu0 %1808, %v373_v20   ;;  %v2047_v48 = vsel %vm417_vm1, %v423_v41, %v418_v39  ;;  %v460_v52 = vld [vmem:[%s2552_s5 + $0x28] sm:$0xff]  ;;  %v493_v53 = vld [vmem:[%s2552_s5 + $0x130] sm:$0xff]  ;;  %v475_v54 = vld [vmem:[%s2552_s5 + $0xa0] sm:$0xff] }
  0x1a   : > { %1498 = vmatpush3.msra.mxu0 %v466_v21  ;;  %1660 = vmatpush3.msra.mxu1 %v498_v25  ;;  %v459_v55 = vld [vmem:[%s2552_s5 + $0x20] sm:$0xff]  ;;  %v492_v56 = vld [vmem:[%s2552_s5 + $0x128] sm:$0xff]  ;;  %v474_v57 = vld [vmem:[%s2552_s5 + $0x98] sm:$0xff] }
  0x1b   : > { %1499 = vmatprep.subr.mxu0 %v481_v23  ;;  %1661 = vmatprep.subr.mxu1 %v497_v28  ;;  %v458_v58 = vld [vmem:[%s2552_s5 + $0x18] sm:$0xff]  ;;  %v491_v59 = vld [vmem:[%s2552_s5 + $0x120] sm:$0xff]  ;;  %v473_v60 = vld [vmem:[%s2552_s5 + $0x90] sm:$0xff] }
  0x1c   : > { %1500 = vmatpush3.msra.mxu0 %v465_v24  ;;  %1662 = vmatpush3.msra.mxu1 %v497_v28  ;;  %v457_v61 = vld [vmem:[%s2552_s5 + $0x10] sm:$0xff]  ;;  %v472_v62 = vld [vmem:[%s2552_s5 + $0x88] sm:$0xff]  ;;  %v490_v63 = vld [vmem:[%s2552_s5 + $0x118] sm:$0xff] }
  0x1d   : > { %1501 = vmatprep.subr.mxu0 %v480_v26  ;;  %1663 = vmatprep.subr.mxu1 %v496_v36  ;;  %v456_v0 = vld [vmem:[%s2552_s5 + $0x8] sm:$0xff]  ;;  %v471_v1 = vld [vmem:[%s2552_s5 + $0x80] sm:$0xff]  ;;  %v489_v2 = vld [vmem:[%s2552_s5 + $0x110] sm:$0xff] }
  0x1e   : > { %1502 = vmatpush3.msra.mxu0 %v464_v27  ;;  %1664 = vmatpush3.msra.mxu1 %v496_v36  ;;  %v455_v3 = vld [vmem:[%s2552_s5] sm:$0xff]  ;;  %v488_v4 = vld [vmem:[%s2552_s5 + $0x108] sm:$0xff]  ;;  %v365_v6 = vld [vmem:[%s1986_s14 + $0x10] sm:$0xff] }
  0x1f   : > { %1503 = vmatprep.subr.mxu0 %v479_v30  ;;  %1665 = vmatprep.subr.mxu1 %v495_v43  ;;  %v487_v5 = vld [vmem:[%s2552_s5 + $0x100] sm:$0xff]  ;;  %v385_v10 = vrot.slane %v365_v6, 7  ;;  %v421_v11 = vrot.slane %v365_v6, 1  ;;  %v2160_v30 = vld [vmem:[%s2554_s7 + $0x78] sm:$0xff]  ;;  %v2200_v36 = vld [vmem:[%s2554_s7 + $0x48] sm:$0xff] }
  0x20   : > { %1504 = vmatpush3.msra.mxu0 %v463_v35  ;;  %1666 = vmatpush3.msra.mxu1 %v495_v43  ;;  %v2193_v35 = vld [vmem:[%s2554_s7 + $0x50] sm:$0xff]  ;;  %v2214_v38 = vld [vmem:[%s2554_s7 + $0x38] sm:$0xff] }
  0x21   : > { %1505 = vmatprep.subr.mxu0 %v478_v40  ;;  %1667 = vmatprep.subr.mxu1 %v494_v50  ;;  %v386_v16 = vsel %vm381_vm0, %v383_v31, %v385_v10  ;;  %v422_v17 = vsel %vm417_vm1, %v419_v34, %v421_v11  ;;  %v387_v22 = vsel %vm381_vm0, %v385_v10, %v376_v37  ;;  %v2165_v31 = vld [vmem:[%s2554_s7 + $0x70] sm:$0xff]  ;;  %v2186_v34 = vld [vmem:[%s2554_s7 + $0x58] sm:$0xff]  ;;  %v2207_v37 = vld [vmem:[%s2554_s7 + $0x40] sm:$0xff] }
  0x22   : > { %1506 = vmatpush3.msra.mxu0 %v462_v42  ;;  %1668 = vmatpush3.msra.mxu1 %v494_v50  ;;  %v424_v23 = vsel %vm417_vm1, %v421_v11, %v423_v41  ;;  %v2221_v39 = vld [vmem:[%s2554_s7 + $0x30] sm:$0xff]  ;;  %v2228_v40 = vld [vmem:[%s2554_s7 + $0x28] sm:$0xff]  ;;  %v2235_v41 = vld [vmem:[%s2554_s7 + $0x20] sm:$0xff] }
  0x23   : > { %1507 = vmatprep.subr.mxu0 %v477_v47  ;;  %1669 = vmatprep.subr.mxu1 %v493_v53  ;;  %v2242_v42 = vld [vmem:[%s2554_s7 + $0x18] sm:$0xff]  ;;  %v2249_v43 = vld [vmem:[%s2554_s7 + $0x10] sm:$0xff] }
  0x24   : > { %1508 = vmatpush3.msra.mxu0 %v461_v49  ;;  %1670 = vmatpush3.msra.mxu1 %v493_v53 }
  0x25   : > { %1509 = vmatprep.subr.mxu0 %v476_v51  ;;  %1671 = vmatprep.subr.mxu1 %v492_v56 }
  0x26   : > { %1510 = vmatpush3.msra.mxu0 %v460_v52  ;;  %1672 = vmatpush3.msra.mxu1 %v492_v56 }
  0x27   : > { %1511 = vmatprep.subr.mxu0 %v475_v54  ;;  %1673 = vmatprep.subr.mxu1 %v491_v59 }
  0x28   : > { %1512 = vmatpush3.msra.mxu0 %v459_v55  ;;  %567 = vmatprep.mubr.f32.mxu0 %v363_v32  ;;  %v2172_v32 = vld [vmem:[%s2554_s7 + $0x68] sm:$0xff] }
  0x29   : > { %1513 = vmatprep.subr.mxu0 %v474_v57  ;;  %1674 = vmatpush3.msra.mxu1 %v491_v59 }
  0x2a   : > { %1514 = vmatpush3.msra.mxu0 %v458_v58  ;;  %1675 = vmatprep.subr.mxu1 %v490_v63 }
  0x2b   : > { %1515 = vmatprep.subr.mxu0 %v473_v60  ;;  %1676 = vmatpush3.msra.mxu1 %v490_v63 }
  0x2c   : > { %1516 = vmatpush3.msra.mxu0 %v457_v61  ;;  %1677 = vmatprep.subr.mxu1 %v489_v2 }
  0x2d   : > { %1517 = vmatprep.subr.mxu0 %v472_v62  ;;  %1678 = vmatpush3.msra.mxu1 %v489_v2 }
  0x2e   : > { %1518 = vmatpush3.msra.mxu0 %v456_v0  ;;  %1679 = vmatprep.subr.mxu1 %v488_v4 }
  0x2f   : > { %1519 = vmatprep.subr.mxu0 %v471_v1  ;;  %1680 = vmatpush3.msra.mxu1 %v488_v4 }
  0x30   : > { %1520 = vmatpush3.msra.mxu0 %v455_v3  ;;  %1681 = vmatprep.subr.mxu1 %v487_v5 }
  0x31   : > { %1682 = vmatpush3.msra.mxu1 %v487_v5  ;;  %v677_v5 = vld [vmem:[%s2550_s3] sm:$0xff] }
  0x88   : > { %v2113_v7 = vpop.permute.xlu1 %405  ;;  %v2115_v8 = vpop.permute.xlu0 %395 }
  0x89   : > { %v413_v9 = vmul.f32 %v2115_v8, %v2029_v44  ;;  %v415_v20 = vmul.f32 %v2113_v7, %v386_v16  ;;  %v2256_v44 = vld [vmem:[%s2554_s7 + $0x8] sm:$0xff] }
  0x8b   : > { %568 = vmatmul.mubr.f32.vlgmr.msra.gmra.mxu0 %v413_v9 }
  0x8c   : > { %v2119_v12 = vpop.permute.xlu1 %433  ;;  %v2121_v13 = vpop.permute.xlu0 %400  ;;  %572 = vmatprep.mubr.f32.mxu0 %v1998_v29  ;;  %v1837_v29 = vmov 0.0  }
  0x8d   : > { %v414_v14 = vmul.f32 %v2121_v13, %v2034_v45  ;;  %v451_v15 = vmul.f32 %v2119_v12, %v2039_v46  ;;  %1689 = vmatprep.subr.mxu0 %v1837_v29 }
  0x8e   : > { %1690 = vmatpush3.msra.mxu0 %v2160_v30 }
  0x8f   : > { %573 = vmatmul.mubr.f32.gmra.mxu0 %v414_v14  ;;  %1683 = vmatprep.mubr.f32.mxu1 %v451_v15 }
  0x90   : > { %v2134_v18 = vpop.permute.xlu1 %438  ;;  %v2136_v19 = vpop.permute.xlu0 %410  ;;  %577 = vmatprep.mubr.f32.mxu0 %v365_v6  ;;  %1691 = vmatprep.subr.mxu0 %v1837_v29  ;;  %v753_v6 = vld [vmem:[%s2554_s7] sm:$0xff] }
  0x91   : > { %v452_v21 = vmul.f32 %v2134_v18, %v422_v17  ;;  %v416_v26 = vmul.f32 %v2136_v19, %v387_v22  ;;  %1692 = vmatpush3.msra.mxu0 %v2165_v31 }
  0x92   : > { %1693 = vmatprep.subr.mxu0 %v1837_v29 }
  0x93   : > { %578 = vmatmul.mubr.f32.gmra.mxu0 %v415_v20  ;;  %1684 = vmatmul.mubr.f32.vlgmr.msra.gmra.mxu1 %v452_v21 }
  0x94   : > { %v2146_v24 = vpop.permute.xlu1 %448  ;;  %v2148_v25 = vpop.permute.xlu0 %443  ;;  %582 = vmatprep.mubr.f32.mxu0 %v2006_v33  ;;  %v2179_v33 = vld [vmem:[%s2554_s7 + $0x60] sm:$0xff]  ;;  %1694 = vmatpush3.msra.mxu0 %v2172_v32 }
  0x95   : > { %v454_v27 = vmul.f32 %v2146_v24, %v2047_v48  ;;  %v453_v28 = vmul.f32 %v2148_v25, %v424_v23  ;;  %1695 = vmatprep.subr.mxu0 %v1837_v29 }
  0x96   : > { %1696 = vmatpush3.msra.mxu0 %v2179_v33 }
  0x97   : > { %583 = vmatmul.mubr.f32.gmra.mxu0 %v416_v26  ;;  %1686 = vmatprep.mubr.f32.mxu1 %v453_v28 }
  0x98   : > { %1687 = vmatmul.mubr.f32.gmra.mxu1 %v454_v27  ;;  %1697 = vmatprep.subr.mxu0 %v1837_v29  ;;  %v1481_v27 = vld [vmem:[%s2555_s8] ss:$0 sm:$0xff] }
  0x99   : > { %746 = vmatprep.mubr.f32.mxu1 %v1837_v29  ;;  %1698 = vmatpush3.msra.mxu0 %v2186_v34 }
  0x9a   : > { %1699 = vmatprep.subr.mxu0 %v1837_v29  ;;  %1721 = vmatprep.mubr.msk.f32.mxu0 %vm1838_vm3, %v1837_v29 }
  0x9b   : > { %1700 = vmatpush3.msra.mxu0 %v2193_v35 }
  0x9c   : > { %1701 = vmatprep.subr.mxu0 %v1837_v29 }
  0x9d   : > { %1702 = vmatpush3.msra.mxu0 %v2200_v36 }
  0x9e   : > { %1703 = vmatprep.subr.mxu0 %v1837_v29 }
  0x9f   : > { %1704 = vmatpush3.msra.mxu0 %v2207_v37 }
  0xa0   : > { %1705 = vmatprep.subr.mxu0 %v1837_v29 }
  0xa1   : > { %1706 = vmatpush3.msra.mxu0 %v2214_v38 }
  0xa2   : > { %1707 = vmatprep.subr.mxu0 %v1837_v29 }
  0xa3   : > { %1708 = vmatpush3.msra.mxu0 %v2221_v39 }
  0xa4   : > { %1709 = vmatprep.subr.mxu0 %v1837_v29 }
  0xa5   : > { %1710 = vmatpush3.msra.mxu0 %v2228_v40 }
  0xa6   : > { %1711 = vmatprep.subr.mxu0 %v1837_v29 }
  0xa7   : > { %1712 = vmatpush3.msra.mxu0 %v2235_v41 }
  0xa8   : > { %1713 = vmatprep.subr.mxu0 %v1837_v29 }
  0xa9   : > { %1714 = vmatpush3.msra.mxu0 %v2242_v42 }
  0xaa   : > { %1715 = vmatprep.subr.mxu0 %v1837_v29 }
  0xab   : > { %1716 = vmatpush3.msra.mxu0 %v2249_v43 }
  0xac   : > { %1717 = vmatprep.subr.mxu0 %v1837_v29 }
  0xad   : > { %1718 = vmatpush3.msra.mxu0 %v2256_v44 }
  0xae   : > { %1719 = vmatprep.subr.mxu0 %v1837_v29 }
  0xaf   : > { %1720 = vmatpush3.msra.mxu0 %v753_v6 }
 0x14b   : > { %v1521_v45 = vpop.f32.mrf.mxu0 }
 0x14d   : > { %v1522_v46 = vpop.f32.mrf.mxu0 }
 0x14e   : > { %v1523_v62 = vadd.f32 %v1522_v46, %v1521_v45  ;;  %v1222_v45 = vld [vmem:[%s2553_s6 + $0xe8] sm:$0xff]  ;;  %v1236_v46 = vld [vmem:[%s2553_s6 + $0x158] sm:$0xff] }
 0x14f   : > { %v1524_v47 = vpop.f32.mrf.mxu0 }
 0x151   : > { %v1525_v48 = vpop.f32.mrf.mxu0 }
 0x152   : > { %v1526_v56 = vadd.f32 %v1525_v48, %v1524_v47  ;;  %v1206_v47 = vld [vmem:[%s2553_s6 + $0x68] sm:$0xff]  ;;  %v1221_v48 = vld [vmem:[%s2553_s6 + $0xe0] sm:$0xff] }
 0x153   : > { %v1527_v49 = vpop.f32.mrf.mxu0  ;;  %v1685_v50 = vpop.f32.mrf.mxu1 }
 0x154   : > { %v2266_v63 = vadd.f32 %v1685_v50, %v1526_v56  ;;  %v1205_v50 = vld [vmem:[%s2553_s6 + $0x60] sm:$0xff]  ;;  %v1203_v56 = vld [vmem:[%s2553_s6 + $0x50] sm:$0xff] }
 0x155   : > { %v1528_v51 = vpop.f32.mrf.mxu0  ;;  %v654_v52 = vpop.f32.mrf.mxu1 }
 0x156   : > { %v1529_v57 = vadd.f32 %v1528_v51, %v1527_v49  ;;  %v2270_v1 = vadd.f32 %v1523_v62, %v654_v52  ;;  %v674_v3 = vmul.f32 %v2266_v63, %v2266_v63  ;;  %v1235_v49 = vld [vmem:[%s2553_s6 + $0x150] sm:$0xff]  ;;  %v1220_v51 = vld [vmem:[%s2553_s6 + $0xd8] sm:$0xff]  ;;  %v1234_v52 = vld [vmem:[%s2553_s6 + $0x148] sm:$0xff] }
 0x157   : > { %v1530_v53 = vpop.f32.mrf.mxu0  ;;  %v1217_v62 = vld [vmem:[%s2553_s6 + $0xc0] sm:$0xff] }
 0x158   : > { %v1688_v54 = vpop.f32.mrf.mxu1  ;;  %v673_v4 = vmul.f32 %v2270_v1, %v2270_v1 }
 0x159   : > { %v1531_v55 = vpop.f32.mrf.mxu0 }
 0x15a   : > { %v1532_v58 = vadd.f32 %v1531_v55, %v1530_v53  ;;  %v664_v59 = vpop.f32.mrf.mxu1  ;;  %v1204_v53 = vld [vmem:[%s2553_s6 + $0x58] sm:$0xff]  ;;  %v1233_v55 = vld [vmem:[%s2553_s6 + $0x140] sm:$0xff] }
 0x15b   : > { %v2264_v61 = vadd.f32 %v1529_v57, %v664_v59  ;;  %v1218_v57 = vld [vmem:[%s2553_s6 + $0xc8] sm:$0xff] }
 0x15c   : > { %v2262_v60 = vadd.f32 %v1688_v54, %v1532_v58  ;;  %v1219_v54 = vld [vmem:[%s2553_s6 + $0xd0] sm:$0xff]  ;;  %v1232_v58 = vld [vmem:[%s2553_s6 + $0x138] sm:$0xff]  ;;  %v1202_v59 = vld [vmem:[%s2553_s6 + $0x48] sm:$0xff] }
 0x15d   : > { %v675_v2 = vmul.f32 %v2264_v61, %v2264_v61 }
 0x15e   : > { %v676_v0 = vmul.f32 %v2262_v60, %v2262_v60 }
 0x160   : > { %706 = vmatprep.subr.mxu1 %v676_v0  ;;  %v1231_v0 = vld [vmem:[%s2553_s6 + $0x130] sm:$0xff] }
 0x161   : > { %707 = vmatpush1.msra.mxu1 %v2262_v60 }
 0x162   : > { %708 = vmatprep.subr.mxu1 %v675_v2  ;;  %v1201_v2 = vld [vmem:[%s2553_s6 + $0x40] sm:$0xff] }
 0x163   : > { %709 = vmatpush1.msra.mxu1 %v2264_v61 }
 0x164   : > { %710 = vmatprep.subr.mxu1 %v674_v3  ;;  %v1216_v3 = vld [vmem:[%s2553_s6 + $0xb8] sm:$0xff] }
 0x165   : > { %711 = vmatpush1.msra.mxu1 %v2266_v63 }
 0x166   : > { %712 = vmatprep.subr.mxu1 %v673_v4  ;;  %v1230_v4 = vld [vmem:[%s2553_s6 + $0x128] sm:$0xff] }
 0x167   : > { %713 = vmatpush1.msra.mxu1 %v2270_v1 }
 0x168   : > { %1480 = vmatmul.mubr.msk.f32.vlgmr.msra.gmra.mxu1 %vm678_vm2, %v677_v5  ;;  %1724 = vmatprep.subr.mxu1 %v1837_v29  ;;  %v1200_v5 = vld [vmem:[%s2553_s6 + $0x38] sm:$0xff] }
 0x169   : > { %1725 = vmatpush3.msra.mxu1 %v2160_v30  ;;  %1756 = vmatprep.mubr.msk.f32.mxu1 %vm1838_vm3, %v1837_v29 }
 0x16a   : > { %1726 = vmatprep.subr.mxu1 %v1837_v29 }
 0x16b   : > { %1727 = vmatpush3.msra.mxu1 %v2165_v31  ;;  %v1482_v31 = vld [vmem:[%s2556_s9] ss:$0 sm:$0xff] }
 0x16c   : > { %1728 = vmatprep.subr.mxu1 %v1837_v29 }
 0x16d   : > { %1729 = vmatpush3.msra.mxu1 %v2172_v32 }
 0x16e   : > { %1730 = vmatprep.subr.mxu1 %v1837_v29 }
 0x16f   : > { %1731 = vmatpush3.msra.mxu1 %v2179_v33 }
 0x170   : > { %1732 = vmatprep.subr.mxu1 %v1837_v29 }
 0x171   : > { %1733 = vmatpush3.msra.mxu1 %v2186_v34  ;;  %v933_v34 = vld [vmem:[%s2551_s4] sm:$0xff] }
 0x172   : > { %1734 = vmatprep.subr.mxu1 %v1837_v29 }
 0x173   : > { %1735 = vmatpush3.msra.mxu1 %v2193_v35  ;;  %v934_v35 = vld [vmem:[%s2551_s4 + $0x8] sm:$0xff] }
 0x174   : > { %1736 = vmatprep.subr.mxu1 %v1837_v29 }
 0x175   : > { %1737 = vmatpush3.msra.mxu1 %v2200_v36  ;;  %v935_v36 = vld [vmem:[%s2551_s4 + $0x10] sm:$0xff] }
 0x176   : > { %1738 = vmatprep.subr.mxu1 %v1837_v29 }
 0x177   : > { %1739 = vmatpush3.msra.mxu1 %v2207_v37  ;;  %v936_v37 = vld [vmem:[%s2551_s4 + $0x18] sm:$0xff] }
 0x178   : > { %1740 = vmatprep.subr.mxu1 %v1837_v29 }
 0x179   : > { %1741 = vmatpush3.msra.mxu1 %v2214_v38  ;;  %v1240_v38 = vld [vmem:[%s2553_s6 + $0x178] sm:$0xff] }
 0x17a   : > { %1742 = vmatprep.subr.mxu1 %v1837_v29 }
 0x17b   : > { %1743 = vmatpush3.msra.mxu1 %v2221_v39  ;;  %v1239_v39 = vld [vmem:[%s2553_s6 + $0x170] sm:$0xff] }
 0x17c   : > { %1744 = vmatprep.subr.mxu1 %v1837_v29 }
 0x17d   : > { %1745 = vmatpush3.msra.mxu1 %v2228_v40  ;;  %v1238_v40 = vld [vmem:[%s2553_s6 + $0x168] sm:$0xff] }
 0x17e   : > { %1746 = vmatprep.subr.mxu1 %v1837_v29 }
 0x17f   : > { %1747 = vmatpush3.msra.mxu1 %v2235_v41  ;;  %v1208_v41 = vld [vmem:[%s2553_s6 + $0x78] sm:$0xff] }
 0x180   : > { %1748 = vmatprep.subr.mxu1 %v1837_v29 }
 0x181   : > { %1749 = vmatpush3.msra.mxu1 %v2242_v42  ;;  %v1223_v42 = vld [vmem:[%s2553_s6 + $0xf0] sm:$0xff] }
 0x182   : > { %1750 = vmatprep.subr.mxu1 %v1837_v29 }
 0x183   : > { %1751 = vmatpush3.msra.mxu1 %v2249_v43  ;;  %v1237_v43 = vld [vmem:[%s2553_s6 + $0x160] sm:$0xff] }
 0x184   : > { %1752 = vmatprep.subr.mxu1 %v1837_v29 }
 0x185   : > { %1753 = vmatpush3.msra.mxu1 %v2256_v44  ;;  %v1207_v44 = vld [vmem:[%s2553_s6 + $0x70] sm:$0xff] }
 0x186   : > { %1754 = vmatprep.subr.mxu1 %v1837_v29 }
 0x187   : > { %1755 = vmatpush3.msra.mxu1 %v753_v6  ;;  %v1215_v6 = vld [vmem:[%s2553_s6 + $0xb0] sm:$0xff] }
 0x188   : > { %1759 = vmatprep.subr.mxu1 %v1240_v38 }
 0x228   : > { %v748_v9 = vpop.f32.mrf.mxu1 }
 0x229   : > { %1722 = vmatmul.mubr.f32.vlgmr.msra.gmra.mxu0 %v748_v9  ;;  %v1229_v9 = vld [vmem:[%s2553_s6 + $0x120] sm:$0xff] }
 0x22a   : > { %v750_v10 = vpop.f32.mrf.mxu1  ;;  %1014 = vmatprep.mubr.f32.mxu0 %v1837_v29 }
 0x22b   : > { %1757 = vmatmul.mubr.f32.vlgmr.msra.gmra.mxu1 %v750_v10  ;;  %v1199_v10 = vld [vmem:[%s2553_s6 + $0x30] sm:$0xff] }
 0x22c   : > { %1760 = vmatpush3.msra.mxu1 %v1240_v38 }
 0x22d   : > { %1761 = vmatprep.subr.mxu1 %v1239_v39 }
 0x22e   : > { %1762 = vmatpush3.msra.mxu1 %v1239_v39 }
 0x22f   : > { %1763 = vmatprep.subr.mxu1 %v1238_v40 }
 0x230   : > { %1764 = vmatpush3.msra.mxu1 %v1238_v40 }
 0x231   : > { %1765 = vmatprep.subr.mxu1 %v1237_v43 }
 0x232   : > { %1766 = vmatpush3.msra.mxu1 %v1237_v43 }
 0x233   : > { %1767 = vmatprep.subr.mxu1 %v1236_v46 }
 0x234   : > { %1768 = vmatpush3.msra.mxu1 %v1236_v46 }
 0x235   : > { %1769 = vmatprep.subr.mxu1 %v1235_v49 }
 0x236   : > { %1770 = vmatpush3.msra.mxu1 %v1235_v49 }
 0x237   : > { %1771 = vmatprep.subr.mxu1 %v1234_v52 }
 0x238   : > { %1772 = vmatpush3.msra.mxu1 %v1234_v52 }
 0x239   : > { %1773 = vmatprep.subr.mxu1 %v1233_v55 }
 0x23a   : > { %1774 = vmatpush3.msra.mxu1 %v1233_v55 }
 0x23b   : > { %1775 = vmatprep.subr.mxu1 %v1232_v58 }
 0x23c   : > { %1776 = vmatpush3.msra.mxu1 %v1232_v58 }
 0x23d   : > { %1777 = vmatprep.subr.mxu1 %v1231_v0 }
 0x23e   : > { %1778 = vmatpush3.msra.mxu1 %v1231_v0 }
 0x23f   : > { %1779 = vmatprep.subr.mxu1 %v1230_v4 }
 0x240   : > { %1780 = vmatpush3.msra.mxu1 %v1230_v4 }
 0x241   : > { %1781 = vmatprep.subr.mxu1 %v1229_v9 }
 0x242   : > { %1782 = vmatpush3.msra.mxu1 %v1229_v9 }
 0x2e9   : > { %v835_v11 = vpop.f32.mrf.mxu0 }
 0x2ea   : > { %v909_v14 = vmul.f32 0.015625, %v835_v11  ;;  %v1214_v11 = vld [vmem:[%s2553_s6 + $0xa8] sm:$0xff] }
 0x2eb   : > { %v1723_v15 = vpop.f32.mrf.mxu0  ;;  %v905_v16 = vpop.f32.mrf.mxu1 }
 0x2ec   : > { %v911_v17 = vmul.f32 %v909_v14, %v909_v14  ;;  %v910_v20 = vmul.f32 0.015625, %v905_v16  ;;  %v1198_v15 = vld [vmem:[%s2553_s6 + $0x28] sm:$0xff]  ;;  %v1213_v16 = vld [vmem:[%s2553_s6 + $0xa0] sm:$0xff] }
 0x2ed   : > { %v1758_v21 = vpop.f32.mrf.mxu1 }
 0x2ee   : > { %v912_v22 = vsub.f32 %v910_v20, %v911_v17  ;;  %v1227_v17 = vld [vmem:[%s2553_s6 + $0x110] sm:$0xff]  ;;  %v1197_v20 = vld [vmem:[%s2553_s6 + $0x20] sm:$0xff]  ;;  %v1212_v21 = vld [vmem:[%s2553_s6 + $0x98] sm:$0xff] }
 0x2f0   : > { %v913_v23 = vmax.f32 %v912_v22, 0.0  ;;  %v1226_v22 = vld [vmem:[%s2553_s6 + $0x108] sm:$0xff] }
 0x2f2   : > { %v914_v26 = vadd.f32 1e-05, %v913_v23  ;;  %v1196_v23 = vld [vmem:[%s2553_s6 + $0x18] sm:$0xff] }
 0x2f4   : > { %1810 = vrsqrt.f32 %v914_v26  ;;  %v1211_v26 = vld [vmem:[%s2553_s6 + $0x90] sm:$0xff] }
 0x301   : > { %v1811_v28 = vpop.eup %1810 }
 0x302   : > { %v923_v30 = vmul.f32 %v1811_v28, %v1481_v27  ;;  %v1225_v27 = vld [vmem:[%s2553_s6 + $0x100] sm:$0xff]  ;;  %v1195_v28 = vld [vmem:[%s2553_s6 + $0x10] sm:$0xff] }
 0x304   : > { %v925_v32 = vmul.f32 %v923_v30, %v909_v14  ;;  %v1228_v14 = vld [vmem:[%s2553_s6 + $0x118] sm:$0xff] }
 0x305   : > { %1783 = vmatprep.subr.mxu1 %v1228_v14 }
 0x306   : > { %v932_v33 = vsub.f32 %v1482_v31, %v925_v32  ;;  %1784 = vmatpush3.msra.mxu1 %v1228_v14  ;;  %v1194_v31 = vld [vmem:[%s2553_s6 + $0x8] sm:$0xff]  ;;  %v1209_v32 = vld [vmem:[%s2553_s6 + $0x80] sm:$0xff] }
 0x307   : > { %1785 = vmatprep.subr.mxu1 %v1227_v17 }
 0x308   : > { %980 = vmatprep.subr.mxu0 %v932_v33  ;;  %1786 = vmatpush3.msra.mxu1 %v1227_v17  ;;  %v1193_v33 = vld [vmem:[%s2553_s6] sm:$0xff] }
 0x309   : > { %981 = vmatpush1.msra.mxu0 %v923_v30  ;;  %1787 = vmatprep.subr.mxu1 %v1226_v22  ;;  %v1210_v30 = vld [vmem:[%s2553_s6 + $0x88] sm:$0xff] }
 0x30a   : > { %1483 = vmatmul.mubr.msk.f32.vlgmr.msra.gmra.mxu0 %vm937_vm4, %v933_v34  ;;  %1788 = vmatpush3.msra.mxu1 %v1226_v22 }
 0x30b   : > { %1020 = vmatprep.mubr.f32.mxu0 %v1837_v29  ;;  %1789 = vmatprep.subr.mxu1 %v1225_v27 }
 0x30c   : > { %1790 = vmatpush3.msra.mxu1 %v1225_v27 }
 0x30e   : > { %1484 = vmatmul.mubr.msk.f32.gmra.mxu0 %vm937_vm4, %v934_v35 }
 0x30f   : > { %1026 = vmatprep.mubr.f32.mxu0 %v1837_v29 }
 0x312   : > { %1485 = vmatmul.mubr.msk.f32.gmra.mxu0 %vm937_vm4, %v935_v36 }
 0x313   : > { %1032 = vmatprep.mubr.f32.mxu0 %v1837_v29  ;;  %v1224_v29 = vld [vmem:[%s2553_s6 + $0xf8] sm:$0xff] }
 0x314   : > { %1587 = vmatprep.subr.mxu0 %v1224_v29 }
 0x315   : > { %1588 = vmatpush3.msra.mxu0 %v1208_v41 }
 0x316   : > { %1486 = vmatmul.mubr.msk.f32.gmra.mxu0 %vm937_vm4, %v936_v37  ;;  %1589 = vmatprep.subr.mxu0 %v1223_v42 }
 0x317   : > { %1590 = vmatpush3.msra.mxu0 %v1207_v44 }
 0x318   : > { %1591 = vmatprep.subr.mxu0 %v1222_v45 }
 0x319   : > { %1592 = vmatpush3.msra.mxu0 %v1206_v47 }
 0x31a   : > { %1593 = vmatprep.subr.mxu0 %v1221_v48 }
 0x31b   : > { %1594 = vmatpush3.msra.mxu0 %v1205_v50 }
 0x31c   : > { %1595 = vmatprep.subr.mxu0 %v1220_v51 }
 0x31d   : > { %1596 = vmatpush3.msra.mxu0 %v1204_v53 }
 0x31e   : > { %1597 = vmatprep.subr.mxu0 %v1219_v54 }
 0x31f   : > { %1598 = vmatpush3.msra.mxu0 %v1203_v56 }
 0x320   : > { %1599 = vmatprep.subr.mxu0 %v1218_v57 }
 0x321   : > { %1600 = vmatpush3.msra.mxu0 %v1202_v59 }
 0x322   : > { %1601 = vmatprep.subr.mxu0 %v1217_v62 }
 0x323   : > { %1602 = vmatpush3.msra.mxu0 %v1201_v2 }
 0x324   : > { %1603 = vmatprep.subr.mxu0 %v1216_v3 }
 0x325   : > { %1604 = vmatpush3.msra.mxu0 %v1200_v5 }
 0x326   : > { %1605 = vmatprep.subr.mxu0 %v1215_v6 }
 0x327   : > { %1606 = vmatpush3.msra.mxu0 %v1199_v10 }
 0x328   : > { %1607 = vmatprep.subr.mxu0 %v1214_v11 }
 0x329   : > { %1608 = vmatpush3.msra.mxu0 %v1198_v15 }
 0x32a   : > { %1609 = vmatprep.subr.mxu0 %v1213_v16 }
 0x32b   : > { %1610 = vmatpush3.msra.mxu0 %v1197_v20 }
 0x32c   : > { %1611 = vmatprep.subr.mxu0 %v1212_v21 }
 0x32d   : > { %1612 = vmatpush3.msra.mxu0 %v1196_v23 }
 0x32e   : > { %1613 = vmatprep.subr.mxu0 %v1211_v26 }
 0x32f   : > { %1614 = vmatpush3.msra.mxu0 %v1195_v28 }
 0x330   : > { %1615 = vmatprep.subr.mxu0 %v1210_v30 }
 0x331   : > { %1616 = vmatpush3.msra.mxu0 %v1194_v31 }
 0x332   : > { %1617 = vmatprep.subr.mxu0 %v1209_v32 }
 0x333   : > { %1618 = vmatpush3.msra.mxu0 %v1193_v33 }
 0x3ca   : > { %v1016_v34 = vpop.f32.mrf.mxu0 }
 0x3cb   : > { %v1039_v35 = vmul.f32 %v1016_v34, %v2270_v1 }
 0x3cc   : > { %v1018_v36 = vpop.f32.mrf.mxu0 }
 0x3cd   : > { %v2488_v37 = vadd.f32 %v1039_v35, %v1018_v36 }
 0x3ce   : > { %v1022_v38 = vpop.f32.mrf.mxu0 }
 0x3cf   : > { %v2491_v39 = vmul.f32 0.70710677, %v2488_v37  ;;  %v1040_v29 = vmul.f32 %v1022_v38, %v2266_v63 }
 0x3d0   : > { %v1024_v40 = vpop.f32.mrf.mxu0 }
 0x3d1   : > { %v1055_v41 = vand.u32 2147483647, %v2491_v39  ;;  %v2495_v42 = vadd.f32 %v1040_v29, %v1024_v40  ;;  %vm1135_vm5 = vcmp.lt.f32.partialorder %v2491_v39, 0.0 }
 0x3d2   : > { %v1028_v43 = vpop.f32.mrf.mxu0 }
 0x3d3   : > { %v1059_v44 = vmul.f32 0.3275911, %v1055_v41  ;;  %v2498_v45 = vmul.f32 0.70710677, %v2495_v42  ;;  %v1041_v1 = vmul.f32 %v1028_v43, %v2264_v61  ;;  %v1111_v58 = vsub.f32 0.0, %v1055_v41 }
 0x3d4   : > { %v1030_v46 = vpop.f32.mrf.mxu0 }
 0x3d5   : > { %v1063_v47 = vadd.f32 1.0, %v1059_v44  ;;  %v1056_v48 = vand.u32 2147483647, %v2498_v45  ;;  %v2502_v49 = vadd.f32 %v1041_v1, %v1030_v46  ;;  %v1115_v2 = vmul.f32 %v1111_v58, %v1055_v41 }
 0x3d6   : > { %v1034_v50 = vpop.f32.mrf.mxu0  ;;  %vm1136_vm6 = vcmp.lt.f32.partialorder %v2498_v45, 0.0 }
 0x3d7   : > { %1812 = vrcp.f32 %v1063_v47  ;;  %v1060_v63 = vmul.f32 0.3275911, %v1056_v48  ;;  %v2505_v51 = vmul.f32 0.70710677, %v2502_v49  ;;  %v1042_v52 = vmul.f32 %v1034_v50, %v2262_v60 }
 0x3d8   : > { %v1036_v53 = vpop.f32.mrf.mxu0  ;;  %v1112_v3 = vsub.f32 0.0, %v1056_v48  ;;  %v1119_v5 = vmul.f32 1.442695, %v1115_v2 }
 0x3d9   : > { %v1064_v54 = vadd.f32 1.0, %v1060_v63  ;;  %v1057_v55 = vand.u32 2147483647, %v2505_v51  ;;  %v2509_v56 = vadd.f32 %v1042_v52, %v1036_v53  ;;  %vm1137_vm7 = vcmp.lt.f32.partialorder %v2505_v51, 0.0 }
 0x3da   : > { %v1116_v6 = vmul.f32 %v1112_v3, %v1056_v48 }
 0x3db   : > { %1814 = vrcp.f32 %v1064_v54  ;;  %v1061_v61 = vmul.f32 0.3275911, %v1057_v55  ;;  %v2512_v57 = vmul.f32 0.70710677, %v2509_v56  ;;  %v1113_v10 = vsub.f32 0.0, %v1057_v55 }
 0x3dc   : > { %v1121_v16 = vmul.f32 1.442695, %v1116_v6 }
 0x3dd   : > { %v1065_v59 = vadd.f32 1.0, %v1061_v61  ;;  %v1058_v62 = vand.u32 2147483647, %v2512_v57  ;;  %v1117_v20 = vmul.f32 %v1113_v10, %v1057_v55  ;;  %vm1138_vm8 = vcmp.lt.f32.partialorder %v2512_v57, 0.0 }
 0x3df   : > { %1816 = vrcp.f32 %v1065_v59  ;;  %v1062_v0 = vmul.f32 0.3275911, %v1058_v62  ;;  %v1114_v21 = vsub.f32 0.0, %v1058_v62  ;;  %v1123_v31 = vmul.f32 1.442695, %v1117_v20 }
 0x3e1   : > { %v1066_v60 = vadd.f32 1.0, %v1062_v0  ;;  %v1118_v32 = vmul.f32 %v1114_v21, %v1058_v62 }
 0x3e3   : > { %1818 = vrcp.f32 %v1066_v60  ;;  %v1125_v43 = vmul.f32 1.442695, %v1118_v32 }
 0x3e4   : > { %v1813_v4 = vpop.eup %1812  ;;  %1820 = vpow2.f32 %v1119_v5 }
 0x3e5   : > { %v1075_v9 = vmul.f32 1.0614054, %v1813_v4  ;;  %1822 = vpow2.f32 %v1121_v16 }
 0x3e6   : > { %1824 = vpow2.f32 %v1123_v31 }
 0x3e7   : > { %v1079_v11 = vadd.f32 -1.4531521, %v1075_v9  ;;  %1826 = vpow2.f32 %v1125_v43 }
 0x3e8   : > { %v1815_v14 = vpop.eup %1814 }
 0x3e9   : > { %v1076_v15 = vmul.f32 1.0614054, %v1815_v14  ;;  %v1083_v17 = vmul.f32 %v1813_v4, %v1079_v11  ;;  %v1047_v11 = vmul.f32 0.5, %v2488_v37 }
 0x3eb   : > { %v1080_v22 = vadd.f32 -1.4531521, %v1076_v15  ;;  %v1087_v23 = vadd.f32 1.4214138, %v1083_v17 }
 0x3ec   : > { %v1817_v26 = vpop.eup %1816 }
 0x3ed   : > { %v1084_v27 = vmul.f32 %v1815_v14, %v1080_v22  ;;  %v1091_v28 = vmul.f32 %v1813_v4, %v1087_v23  ;;  %v1077_v30 = vmul.f32 1.0614054, %v1817_v26 }
 0x3ef   : > { %v1088_v33 = vadd.f32 1.4214138, %v1084_v27  ;;  %v1095_v34 = vadd.f32 -0.28449672, %v1091_v28  ;;  %v1081_v35 = vadd.f32 -1.4531521, %v1077_v30 }
 0x3f0   : > { %v1819_v36 = vpop.eup %1818  ;;  %v1048_v28 = vmul.f32 0.5, %v2495_v42 }
 0x3f1   : > { %v1092_v38 = vmul.f32 %v1815_v14, %v1088_v33  ;;  %v1099_v29 = vmul.f32 %v1813_v4, %v1095_v34  ;;  %v1085_v40 = vmul.f32 %v1817_v26, %v1081_v35  ;;  %v1078_v41 = vmul.f32 1.0614054, %v1819_v36  ;;  %v1821_v63 = vpop.eup %1820 }
 0x3f2   : > { %v1823_v0 = vpop.eup %1822 }
 0x3f3   : > { %v1096_v44 = vadd.f32 -0.28449672, %v1092_v38  ;;  %v1103_v1 = vadd.f32 0.2548296, %v1099_v29  ;;  %v1089_v46 = vadd.f32 1.4214138, %v1085_v40  ;;  %v1825_v20 = vpop.eup %1824 }
 0x3f4   : > { %v1082_v47 = vadd.f32 -1.4531521, %v1078_v41  ;;  %v1827_v32 = vpop.eup %1826  ;;  %v1049_v29 = vmul.f32 0.5, %v2502_v49 }
 0x3f5   : > { %v1100_v48 = vmul.f32 %v1815_v14, %v1096_v44  ;;  %v1107_v50 = vmul.f32 %v1813_v4, %v1103_v1  ;;  %v1093_v52 = vmul.f32 %v1817_v26, %v1089_v46  ;;  %v1050_v46 = vmul.f32 0.5, %v2509_v56 }
 0x3f6   : > { %v1086_v53 = vmul.f32 %v1819_v36, %v1082_v47 }
 0x3f7   : > { %v1104_v54 = vadd.f32 0.2548296, %v1100_v48  ;;  %v1127_v55 = vmul.f32 %v1821_v63, %v1107_v50  ;;  %v1097_v61 = vadd.f32 -0.28449672, %v1093_v52 }
 0x3f8   : > { %v1090_v58 = vadd.f32 1.4214138, %v1086_v53 }
 0x3f9   : > { %v1108_v59 = vmul.f32 %v1815_v14, %v1104_v54  ;;  %v1131_v62 = vsub.f32 1.0, %v1127_v55  ;;  %v1101_v2 = vmul.f32 %v1817_v26, %v1097_v61 }
 0x3fa   : > { %v1094_v3 = vmul.f32 %v1819_v36, %v1090_v58 }
 0x3fb   : > { %v1128_v60 = vmul.f32 %v1823_v0, %v1108_v59  ;;  %v1139_v5 = vsub.f32 0.0, %v1131_v62  ;;  %v1105_v6 = vadd.f32 0.2548296, %v1101_v2 }
 0x3fc   : > { %v1098_v9 = vadd.f32 -0.28449672, %v1094_v3 }
 0x3fd   : > { %v1132_v4 = vsub.f32 1.0, %v1128_v60  ;;  %v1143_v10 = vsel %vm1135_vm5, %v1139_v5, %v1131_v62  ;;  %v1109_v15 = vmul.f32 %v1817_v26, %v1105_v6 }
 0x3fe   : > { %v1102_v16 = vmul.f32 %v1819_v36, %v1098_v9  ;;  %v1147_v17 = vadd.f32 1.0, %v1143_v10 }
 0x3ff   : > { %v1140_v21 = vsub.f32 0.0, %v1132_v4  ;;  %v1129_v14 = vmul.f32 %v1825_v20, %v1109_v15 }
 0x400   : > { %v1106_v22 = vadd.f32 0.2548296, %v1102_v16  ;;  %v1151_v23 = vmul.f32 %v1147_v17, %v1047_v11 }
 0x401   : > { %v1144_v27 = vsel %vm1136_vm6, %v1140_v21, %v1132_v4  ;;  %v1133_v30 = vsub.f32 1.0, %v1129_v14 }
 0x402   : > { %v1148_v39 = vadd.f32 1.0, %v1144_v27  ;;  %v1110_v31 = vmul.f32 %v1819_v36, %v1106_v22  ;;  %1305 = vmatprep.mubr.f32.mxu0 %v1151_v23  ;;  %v1176_v45 = vrot.slane %v1151_v23, 1  ;;  %v1161_v53 = vrot.slane %v1151_v23, 7 }
 0x403   : > { %v1141_v37 = vsub.f32 0.0, %v1133_v30 }
 0x404   : > { %v1152_v33 = vmul.f32 %v1148_v39, %v1048_v28  ;;  %v1130_v26 = vmul.f32 %v1827_v32, %v1110_v31 }
 0x405   : > { %v1145_v35 = vsel %vm1137_vm7, %v1141_v37, %v1133_v30 }
 0x406   : > { %v1177_v34 = vrot.slane %v1152_v33, 1  ;;  %v1134_v38 = vsub.f32 1.0, %v1130_v26  ;;  %v1149_v40 = vadd.f32 1.0, %v1145_v35  ;;  %v1162_v50 = vrot.slane %v1152_v33, 7 }
 0x408   : > { %v1142_v41 = vsub.f32 0.0, %v1134_v38  ;;  %v1178_v42 = vsel %vm417_vm1, %v1176_v45, %v1177_v34  ;;  %v1153_v43 = vmul.f32 %v1149_v40, %v1049_v29 }
 0x409   : > { %v1189_v36 = vmul.f32 %v1178_v42, %v2119_v12 }
 0x40a   : > { %v1146_v44 = vsel %vm1138_vm8, %v1142_v41, %v1134_v38  ;;  %v1179_v1 = vrot.slane %v1153_v43, 1  ;;  %v1164_v58 = vrot.slane %v1153_v43, 7 }
 0x40b   : > { %v1150_v51 = vadd.f32 1.0, %v1146_v44  ;;  %1791 = vmatprep.mubr.f32.mxu1 %v1189_v36 }
 0x40c   : > { %v1180_v48 = vsel %vm417_vm1, %v1177_v34, %v1179_v1  ;;  %v1165_v62 = vsel %vm381_vm0, %v1162_v50, %v1164_v58 }
 0x40d   : > { %v1154_v47 = vmul.f32 %v1150_v51, %v1050_v46  ;;  %v1190_v49 = vmul.f32 %v1180_v48, %v2134_v18  ;;  %v1163_v18 = vsel %vm381_vm0, %v1161_v53, %v1162_v50 }
 0x40e   : > { %v1173_v59 = vmul.f32 %v1163_v18, %v2121_v13 }
 0x40f   : > { %v1156_v63 = vrot.slane %v1154_v47, 7  ;;  %v1181_v52 = vrot.slane %v1154_v47, 1  ;;  %1792 = vmatmul.mubr.f32.vlgmr.msra.gmra.mxu1 %v1190_v49 }
 0x411   : > { %v1171_v57 = vsel %vm381_vm0, %v1156_v63, %v1161_v53  ;;  %v1182_v12 = vsel %vm417_vm1, %v1179_v1, %v1181_v52  ;;  %v1188_v54 = vsel %vm417_vm1, %v1181_v52, %v1176_v45 }
 0x412   : > { %v1172_v56 = vmul.f32 %v1171_v57, %v2115_v8  ;;  %v1191_v55 = vmul.f32 %v1182_v12, %v2148_v25  ;;  %v1192_v61 = vmul.f32 %v1188_v54, %v2146_v24  ;;  %v1174_v8 = vmul.f32 %v1165_v62, %v2113_v7 }
 0x413   : > { %v1166_v25 = vsel %vm381_vm0, %v1164_v58, %v1156_v63 }
 0x414   : > { %1306 = vmatmul.mubr.f32.vlgmr.msra.gmra.mxu0 %v1172_v56  ;;  %1794 = vmatprep.mubr.f32.mxu1 %v1191_v55  ;;  %v1175_v24 = vmul.f32 %v1166_v25, %v2136_v19 }
 0x415   : > { %1310 = vmatprep.mubr.f32.mxu0 %v1152_v33  ;;  %1795 = vmatmul.mubr.f32.gmra.mxu1 %v1192_v61 }
 0x418   : > { %1311 = vmatmul.mubr.f32.gmra.mxu0 %v1173_v59 }
 0x419   : > { %1315 = vmatprep.mubr.f32.mxu0 %v1153_v43 }
 0x41c   : > { %1316 = vmatmul.mubr.f32.gmra.mxu0 %v1174_v8 }
 0x41d   : > { %1320 = vmatprep.mubr.f32.mxu0 %v1154_v47 }
 0x420   : > { %1321 = vmatmul.mubr.f32.gmra.mxu0 %v1175_v24 }
 0x4cf   : > { %v1793_v0 = vpop.f32.mrf.mxu1 }
 0x4d1   : > { %v1392_v5 = vpop.f32.mrf.mxu1 }
 0x4d4   : > { %v1619_v2 = vpop.f32.mrf.mxu0 }
 0x4d5   : > { %v1796_v4 = vpop.f32.mrf.mxu1 }
 0x4d6   : > { %v1620_v3 = vpop.f32.mrf.mxu0 }
 0x4d7   : > { %v1621_v60 = vadd.f32 %v1620_v3, %v1619_v2  ;;  %v1402_v16 = vpop.f32.mrf.mxu1 }
 0x4d8   : > { %v1622_v13 = vpop.f32.mrf.mxu0 }
 0x4d9   : > { %v1393_v6 = vadd.f32 %v1621_v60, %v1392_v5 }
 0x4da   : > { %v1623_v7 = vpop.f32.mrf.mxu0 }
 0x4db   : > { %1411 = vst [vmem:[%s361_s22] sm:$0xff] %v1393_v6  ;;  %v1624_v9 = vadd.f32 %v1623_v7, %v1622_v13 }
 0x4dc   : > { %v1625_v10 = vpop.f32.mrf.mxu0 }
 0x4dd   : > { %v1398_v11 = vadd.f32 %v1793_v0, %v1624_v9 }
 0x4de   : > { %v1626_v19 = vpop.f32.mrf.mxu0 }
 0x4df   : > { %1412 = vst [vmem:[%s361_s22 + $0x8] sm:$0xff] %v1398_v11  ;;  %v1627_v15 = vadd.f32 %v1626_v19, %v1625_v10 }
 0x4e0   : > { %v1628_v17 = vpop.f32.mrf.mxu0 }
 0x4e1   : > { %v1403_v20 = vadd.f32 %v1627_v15, %v1402_v16 }
 0x4e2   : > { %v1629_v21 = vpop.f32.mrf.mxu0 }
 0x4e3   : > { %1413 = vst [vmem:[%s361_s22 + $0x10] sm:$0xff] %v1403_v20  ;;  %v1630_v14 = vadd.f32 %v1629_v21, %v1628_v17 }
 0x4e5   : > { %v1408_v22 = vadd.f32 %v1796_v4, %v1630_v14 }
 0x4e7   : > { %1414 = vst [vmem:[%s361_s22 + $0x18] sm:$0xff] %v1408_v22 }
 0x4e8 PF: > { %s20_s13 = sadd.s32 1, %s1834_s13  }
 0x4e9   : > { %p17_p4 = scmp.ge.s32.totalorder %s20_s13, 4  }
 0x4eb   :  { %19 = sbr.rel (!%p17_p4) target bundleno = 1 (0x1), region = 90 }

</bundles_post_ra>
